<compile_context>
chip_gen: v5e
topology: v5e:2x2
jax: 0.10.0
libtpu: 0.0.40
codegen_flags: <defaults>
</compile_context>

<pallas_src>
import functools

import jax
import jax.numpy as jnp
from jax.experimental import pallas as pl
from jax.experimental.pallas import tpu as pltpu


# ----------------------------------------------------------------------------- kernels

def _encoder_train_kernel(x_ref, w1_ref, b1_ref, w2_ref, b2_ref, w3_ref, b3_ref,
                          wh_ref, bh_ref, eps_ref, z_ref, mu_ref, sp_ref):
    out_dim = mu_ref.shape[-1]

    # x.float() in PyTorch -> f32, then bf16 into the MXU, f32 accumulation.
    x = x_ref[...].astype(jnp.float32)

    h = jnp.dot(x.astype(jnp.bfloat16), w1_ref[...],
                preferred_element_type=jnp.float32) + b1_ref[...]
    h = jnp.maximum(h, 0.0)
    h = jnp.dot(h.astype(jnp.bfloat16), w2_ref[...],
                preferred_element_type=jnp.float32) + b2_ref[...]
    h = jnp.maximum(h, 0.0)
    h = jnp.dot(h.astype(jnp.bfloat16), w3_ref[...],
                preferred_element_type=jnp.float32) + b3_ref[...]
    h = jnp.maximum(h, 0.0)

    # Fused heads: one (hidden, 2*out_dim) matmul, lane-dense 1024-wide result.
    head = jnp.dot(h.astype(jnp.bfloat16), wh_ref[...],
                   preferred_element_type=jnp.float32) + bh_ref[...]
    mu = head[:, :out_dim]
    sp = head[:, out_dim:]

    # reparameterize(training=True): z = eps * exp(0.5*sp) + mu   (f32 elementwise)
    std = jnp.exp(0.5 * sp)
    z_ref[...] = eps_ref[...] * std + mu
    mu_ref[...] = mu
    sp_ref[...] = sp


def _encoder_eval_kernel(x_ref, w1_ref, b1_ref, w2_ref, b2_ref, w3_ref, b3_ref,
                         wh_ref, bh_ref, mu_ref, sp_ref):
    out_dim = mu_ref.shape[-1]
    x = x_ref[...].astype(jnp.float32)

    h = jnp.dot(x.astype(jnp.bfloat16), w1_ref[...],
                preferred_element_type=jnp.float32) + b1_ref[...]
    h = jnp.maximum(h, 0.0)
    h = jnp.dot(h.astype(jnp.bfloat16), w2_ref[...],
                preferred_element_type=jnp.float32) + b2_ref[...]
    h = jnp.maximum(h, 0.0)
    h = jnp.dot(h.astype(jnp.bfloat16), w3_ref[...],
                preferred_element_type=jnp.float32) + b3_ref[...]
    h = jnp.maximum(h, 0.0)

    head = jnp.dot(h.astype(jnp.bfloat16), wh_ref[...],
                   preferred_element_type=jnp.float32) + bh_ref[...]
    mu_ref[...] = head[:, :out_dim]
    sp_ref[...] = head[:, out_dim:]


# ----------------------------------------------------------------------------- wrapper

def _round_up(x, m):
    return ((x + m - 1) // m) * m


@functools.partial(jax.jit, static_argnames=("is_train", "tile_b"))
def encoder_forward(x, params, eps=None, is_train=True, tile_b=512):
    """Runs the Encoder forward pass as a batch-tiled Pallas kernel.

    x:      (B, in_size) float array
    params: packed dict (see pack_params): bf16 weights, f32 biases, fused heads
    eps:    (B, out_dim) f32 standard-normal noise (required when is_train)
    returns (z_sample, mu, sp), each (B, out_dim) float32
    """
    B, in_size = x.shape
    h2 = params["w1"].shape[1]
    hidden = params["w2"].shape[1]
    out_dim = params["wh"].shape[1] // 2

    # Batch tile: multiple of 8 sublanes, capped (safe for v7x's 64 MiB VMEM).
    tb = min(tile_b, _round_up(B, 8))
    tb = _round_up(tb, 8)
    Bp = _round_up(B, tb)

    x = x.astype(jnp.float32)
    if Bp != B:
        x = jnp.pad(x, ((0, Bp - B), (0, 0)))
    grid = (Bp // tb,)

    # Weights/biases: resident across all grid steps (index_map -> block (0, 0)).
    def _resident(shape):
        return pl.BlockSpec(shape, lambda i: (0, 0))

    weight_specs = [
        _resident((in_size, h2)),  _resident((1, h2)),        # w1, b1
        _resident((h2, hidden)),   _resident((1, hidden)),    # w2, b2
        _resident((hidden, hidden)), _resident((1, hidden)),  # w3, b3
        _resident((hidden, 2 * out_dim)), _resident((1, 2 * out_dim)),  # wh, bh
    ]
    x_spec = pl.BlockSpec((tb, in_size), lambda i: (i, 0))
    out_spec = pl.BlockSpec((tb, out_dim), lambda i: (i, 0))

    compiler_params = pltpu.CompilerParams(
        dimension_semantics=("parallel",),
        vmem_limit_bytes=32 * 1024 * 1024,
    )

    weight_args = (params["w1"], params["b1"], params["w2"], params["b2"],
                   params["w3"], params["b3"], params["wh"], params["bh"])

    if is_train:
        eps = eps.astype(jnp.float32)
        if Bp != B:
            eps = jnp.pad(eps, ((0, Bp - B), (0, 0)))
        eps_spec = pl.BlockSpec((tb, out_dim), lambda i: (i, 0))

        z, mu, sp = pl.pallas_call(
            _encoder_train_kernel,
            grid=grid,
            in_specs=[x_spec] + weight_specs + [eps_spec],
            out_specs=(out_spec, out_spec, out_spec),
            out_shape=(
                jax.ShapeDtypeStruct((Bp, out_dim), jnp.float32),
                jax.ShapeDtypeStruct((Bp, out_dim), jnp.float32),
                jax.ShapeDtypeStruct((Bp, out_dim), jnp.float32),
            ),
            compiler_params=compiler_params,
        )(x, *weight_args, eps)
        return z[:B], mu[:B], sp[:B]
    else:
        # Eval kernel: no eps DMA, no exp, no z writeback; z_sample = mu.
        mu, sp = pl.pallas_call(
            _encoder_eval_kernel,
            grid=grid,
            in_specs=[x_spec] + weight_specs,
            out_specs=(out_spec, out_spec),
            out_shape=(
                jax.ShapeDtypeStruct((Bp, out_dim), jnp.float32),
                jax.ShapeDtypeStruct((Bp, out_dim), jnp.float32),
            ),
            compiler_params=compiler_params,
        )(x, *weight_args)
        mu, sp = mu[:B], sp[:B]
        return mu, mu, sp


# ----------------------------------------------------------------------------- params

def init_params(key, in_size, hidden_dim=512, out_dim=512):
    """Synthetic parameters matching nn.Linear shapes (stored transposed: (in, out))."""
    h2 = hidden_dim // 2
    keys = jax.random.split(key, 10)

    def lin(kw, kb, fan_in, fan_out):
        bound = 1.0 / jnp.sqrt(fan_in)
        w = jax.random.uniform(kw, (fan_in, fan_out), jnp.float32, -bound, bound)
        b = jax.random.uniform(kb, (1, fan_out), jnp.float32, -bound, bound)
        return w, b

    w1, b1 = lin(keys[0], keys[1], in_size, h2)
    w2, b2 = lin(keys[2], keys[3], h2, hidden_dim)
    w3, b3 = lin(keys[4], keys[5], hidden_dim, hidden_dim)
    wmu, bmu = lin(keys[6], keys[7], hidden_dim, out_dim)
    wsp, bsp = lin(keys[8], keys[9], hidden_dim, out_dim)
    return dict(w1=w1, b1=b1, w2=w2, b2=b2, w3=w3, b3=b3,
                wmu=wmu, bmu=bmu, wsp=wsp, bsp=bsp)


def pack_params(p):
    """Pack raw f32 params for the kernel: bf16 weights, fused mu/sp head, f32 biases."""
    return dict(
        w1=p["w1"].astype(jnp.bfloat16), b1=p["b1"].astype(jnp.float32),
        w2=p["w2"].astype(jnp.bfloat16), b2=p["b2"].astype(jnp.float32),
        w3=p["w3"].astype(jnp.bfloat16), b3=p["b3"].astype(jnp.float32),
        wh=jnp.concatenate([p["wmu"], p["wsp"]], axis=1).astype(jnp.bfloat16),
        bh=jnp.concatenate([p["bmu"], p["bsp"]], axis=1).astype(jnp.float32),
    )


# ----------------------------------------------------------------------------- reference

def reference_forward(x, packed, eps):
    """Pure-JAX reference computing the same bf16-matmul / f32-elementwise math."""
    def dot(a, w):
        return jnp.dot(a.astype(jnp.bfloat16), w, preferred_element_type=jnp.float32)

    out_dim = packed["wh"].shape[1] // 2
    x = x.astype(jnp.float32)
    h = jax.nn.relu(dot(x, packed["w1"]) + packed["b1"])
    h = jax.nn.relu(dot(h, packed["w2"]) + packed["b2"])
    h = jax.nn.relu(dot(h, packed["w3"]) + packed["b3"])
    head = dot(h, packed["wh"]) + packed["bh"]
    mu, sp = head[:, :out_dim], head[:, out_dim:]
    z = eps * jnp.exp(0.5 * sp) + mu
    return z, mu, sp


# ----------------------------------------------------------------------------- main

if __name__ == "__main__":
    key = jax.random.PRNGKey(0)
    k_x, k_p, k_eps = jax.random.split(key, 3)

    # Small forward-consistent shapes; tile_b=8 -> 2 grid steps (exercises the
    # batch grid, resident weights, and the parallel dimension semantics).
    B, IN_SIZE, HIDDEN, OUT = 16, 32, 64, 512
    x = jax.random.normal(k_x, (B, IN_SIZE), jnp.float32)
    raw = init_params(k_p, IN_SIZE, hidden_dim=HIDDEN, out_dim=OUT)
    params = pack_params(raw)
    eps = jax.random.normal(k_eps, (B, OUT), jnp.float32)

    # Training mode.
    z, mu, sp = encoder_forward(x, params, eps, is_train=True, tile_b=8)
    jax.block_until_ready((z, mu, sp))

    z_ref, mu_ref, sp_ref = reference_forward(x, params, eps)
    assert jnp.allclose(z, z_ref, atol=1e-2, rtol=1e-2)
    assert jnp.allclose(mu, mu_ref, atol=1e-2, rtol=1e-2)
    assert jnp.allclose(sp, sp_ref, atol=1e-2, rtol=1e-2)

    # Eval mode: z_sample = mu, no eps / exp inside the kernel.
    z_e, mu_e, sp_e = encoder_forward(x, params, None, is_train=False, tile_b=8)
    jax.block_until_ready((z_e, mu_e, sp_e))
    assert jnp.allclose(mu_e, mu_ref, atol=1e-2, rtol=1e-2)
    assert jnp.allclose(sp_e, sp_ref, atol=1e-2, rtol=1e-2)
    assert jnp.allclose(z_e, mu_e)

    print("KERNEL_OK")
</pallas_src>

<mosaic_0001>
module attributes {stable_mosaic.version = 11 : i64} {
  func.func @_encoder_train_kernel(%arg0: i32, %arg1: memref<8x32xf32, #tpu.memory_space<vmem>>, %arg2: memref<32x32xbf16, #tpu.memory_space<vmem>>, %arg3: memref<1x32xf32, #tpu.memory_space<vmem>>, %arg4: memref<32x64xbf16, #tpu.memory_space<vmem>>, %arg5: memref<1x64xf32, #tpu.memory_space<vmem>>, %arg6: memref<64x64xbf16, #tpu.memory_space<vmem>>, %arg7: memref<1x64xf32, #tpu.memory_space<vmem>>, %arg8: memref<64x1024xbf16, #tpu.memory_space<vmem>>, %arg9: memref<1x1024xf32, #tpu.memory_space<vmem>>, %arg10: memref<8x512xf32, #tpu.memory_space<vmem>>, %arg11: memref<8x512xf32, #tpu.memory_space<vmem>>, %arg12: memref<8x512xf32, #tpu.memory_space<vmem>>, %arg13: memref<8x512xf32, #tpu.memory_space<vmem>>) attributes {dimension_semantics = [#tpu.dimension_semantics<parallel>], iteration_bounds = array<i64: 2>, scalar_prefetch = 0 : i64, scratch_operands = 0 : i64, tpu.core_type = #tpu.core_type<tc>, window_params = [{transform_indices = @transform_0, window_bounds = array<i64: 8, 32>}, {pipeline_mode = #tpu.pipeline_mode<synchronous>, transform_indices = @transform_1, window_bounds = array<i64: 32, 32>}, {pipeline_mode = #tpu.pipeline_mode<synchronous>, transform_indices = @transform_2, window_bounds = array<i64: 1, 32>}, {pipeline_mode = #tpu.pipeline_mode<synchronous>, transform_indices = @transform_3, window_bounds = array<i64: 32, 64>}, {pipeline_mode = #tpu.pipeline_mode<synchronous>, transform_indices = @transform_4, window_bounds = array<i64: 1, 64>}, {pipeline_mode = #tpu.pipeline_mode<synchronous>, transform_indices = @transform_5, window_bounds = array<i64: 64, 64>}, {pipeline_mode = #tpu.pipeline_mode<synchronous>, transform_indices = @transform_6, window_bounds = array<i64: 1, 64>}, {pipeline_mode = #tpu.pipeline_mode<synchronous>, transform_indices = @transform_7, window_bounds = array<i64: 64, 1024>}, {pipeline_mode = #tpu.pipeline_mode<synchronous>, transform_indices = @transform_8, window_bounds = array<i64: 1, 1024>}, {transform_indices = @transform_9, window_bounds = array<i64: 8, 512>}, {transform_indices = @transform_10, window_bounds = array<i64: 8, 512>}, {transform_indices = @transform_11, window_bounds = array<i64: 8, 512>}, {transform_indices = @transform_12, window_bounds = array<i64: 8, 512>}]} {
    %c0 = arith.constant 0 : index
    %c0_0 = arith.constant 0 : index
    %0 = vector.load %arg1[%c0, %c0_0] : memref<8x32xf32, #tpu.memory_space<vmem>>, vector<8x32xf32>
    %1 = arith.truncf %0 : vector<8x32xf32> to vector<8x32xbf16>
    %c0_1 = arith.constant 0 : index
    %c0_2 = arith.constant 0 : index
    %2 = vector.load %arg2[%c0_1, %c0_2] : memref<32x32xbf16, #tpu.memory_space<vmem>>, vector<32x32xbf16>
    %cst = arith.constant dense<0.000000e+00> : vector<8x32xf32>
    %3 = tpu.matmul %1, %2, %cst {dimension_numbers = #tpu.dot_dimension_numbers<[1], [0], [0], [1], [0, 0, 1, 1], [], []>} : vector<8x32xbf16>, vector<32x32xbf16>, vector<8x32xf32> -> vector<8x32xf32>
    %c0_3 = arith.constant 0 : index
    %c0_4 = arith.constant 0 : index
    %4 = vector.load %arg3[%c0_3, %c0_4] : memref<1x32xf32, #tpu.memory_space<vmem>>, vector<1x32xf32>
    %5 = vector.broadcast %4 : vector<1x32xf32> to vector<8x32xf32>
    %6 = arith.addf %3, %5 : vector<8x32xf32>
    %cst_5 = arith.constant 0.000000e+00 : f32
    %7 = vector.broadcast %cst_5 : f32 to vector<8x32xf32>
    %8 = arith.maximumf %6, %7 : vector<8x32xf32>
    %9 = arith.truncf %8 : vector<8x32xf32> to vector<8x32xbf16>
    %c0_6 = arith.constant 0 : index
    %c0_7 = arith.constant 0 : index
    %10 = vector.load %arg4[%c0_6, %c0_7] : memref<32x64xbf16, #tpu.memory_space<vmem>>, vector<32x64xbf16>
    %cst_8 = arith.constant dense<0.000000e+00> : vector<8x64xf32>
    %11 = tpu.matmul %9, %10, %cst_8 {dimension_numbers = #tpu.dot_dimension_numbers<[1], [0], [0], [1], [0, 0, 1, 1], [], []>} : vector<8x32xbf16>, vector<32x64xbf16>, vector<8x64xf32> -> vector<8x64xf32>
    %c0_9 = arith.constant 0 : index
    %c0_10 = arith.constant 0 : index
    %12 = vector.load %arg5[%c0_9, %c0_10] : memref<1x64xf32, #tpu.memory_space<vmem>>, vector<1x64xf32>
    %13 = vector.broadcast %12 : vector<1x64xf32> to vector<8x64xf32>
    %14 = arith.addf %11, %13 : vector<8x64xf32>
    %cst_11 = arith.constant 0.000000e+00 : f32
    %15 = vector.broadcast %cst_11 : f32 to vector<8x64xf32>
    %16 = arith.maximumf %14, %15 : vector<8x64xf32>
    %17 = arith.truncf %16 : vector<8x64xf32> to vector<8x64xbf16>
    %c0_12 = arith.constant 0 : index
    %c0_13 = arith.constant 0 : index
    %18 = vector.load %arg6[%c0_12, %c0_13] : memref<64x64xbf16, #tpu.memory_space<vmem>>, vector<64x64xbf16>
    %cst_14 = arith.constant dense<0.000000e+00> : vector<8x64xf32>
    %19 = tpu.matmul %17, %18, %cst_14 {dimension_numbers = #tpu.dot_dimension_numbers<[1], [0], [0], [1], [0, 0, 1, 1], [], []>} : vector<8x64xbf16>, vector<64x64xbf16>, vector<8x64xf32> -> vector<8x64xf32>
    %c0_15 = arith.constant 0 : index
    %c0_16 = arith.constant 0 : index
    %20 = vector.load %arg7[%c0_15, %c0_16] : memref<1x64xf32, #tpu.memory_space<vmem>>, vector<1x64xf32>
    %21 = vector.broadcast %20 : vector<1x64xf32> to vector<8x64xf32>
    %22 = arith.addf %19, %21 : vector<8x64xf32>
    %cst_17 = arith.constant 0.000000e+00 : f32
    %23 = vector.broadcast %cst_17 : f32 to vector<8x64xf32>
    %24 = arith.maximumf %22, %23 : vector<8x64xf32>
    %25 = arith.truncf %24 : vector<8x64xf32> to vector<8x64xbf16>
    %c0_18 = arith.constant 0 : index
    %c0_19 = arith.constant 0 : index
    %26 = vector.load %arg8[%c0_18, %c0_19] : memref<64x1024xbf16, #tpu.memory_space<vmem>>, vector<64x1024xbf16>
    %cst_20 = arith.constant dense<0.000000e+00> : vector<8x1024xf32>
    %27 = tpu.matmul %25, %26, %cst_20 {dimension_numbers = #tpu.dot_dimension_numbers<[1], [0], [0], [1], [0, 0, 1, 1], [], []>} : vector<8x64xbf16>, vector<64x1024xbf16>, vector<8x1024xf32> -> vector<8x1024xf32>
    %c0_21 = arith.constant 0 : index
    %c0_22 = arith.constant 0 : index
    %28 = vector.load %arg9[%c0_21, %c0_22] : memref<1x1024xf32, #tpu.memory_space<vmem>>, vector<1x1024xf32>
    %29 = vector.broadcast %28 : vector<1x1024xf32> to vector<8x1024xf32>
    %30 = arith.addf %27, %29 : vector<8x1024xf32>
    %31 = vector.extract_strided_slice %30 {offsets = [0, 0], sizes = [8, 512], strides = [1, 1]} : vector<8x1024xf32> to vector<8x512xf32>
    %32 = vector.extract_strided_slice %30 {offsets = [0, 512], sizes = [8, 512], strides = [1, 1]} : vector<8x1024xf32> to vector<8x512xf32>
    %cst_23 = arith.constant 5.000000e-01 : f32
    %33 = vector.broadcast %cst_23 : f32 to vector<8x512xf32>
    %34 = arith.mulf %33, %32 : vector<8x512xf32>
    %35 = math.exp %34 : vector<8x512xf32>
    %c0_24 = arith.constant 0 : index
    %c0_25 = arith.constant 0 : index
    %36 = vector.load %arg10[%c0_24, %c0_25] : memref<8x512xf32, #tpu.memory_space<vmem>>, vector<8x512xf32>
    %37 = arith.mulf %36, %35 : vector<8x512xf32>
    %38 = arith.addf %37, %31 : vector<8x512xf32>
    %c0_26 = arith.constant 0 : index
    %c0_27 = arith.constant 0 : index
    %39 = vector.load %arg11[%c0_26, %c0_27] : memref<8x512xf32, #tpu.memory_space<vmem>>, vector<8x512xf32>
    tpu.vector_store %arg11[%c0_26, %c0_27], %38 {strides = array<i32>} : memref<8x512xf32, #tpu.memory_space<vmem>>, vector<8x512xf32>,
    %c0_28 = arith.constant 0 : index
    %c0_29 = arith.constant 0 : index
    %40 = vector.load %arg12[%c0_28, %c0_29] : memref<8x512xf32, #tpu.memory_space<vmem>>, vector<8x512xf32>
    tpu.vector_store %arg12[%c0_28, %c0_29], %31 {strides = array<i32>} : memref<8x512xf32, #tpu.memory_space<vmem>>, vector<8x512xf32>,
    %c0_30 = arith.constant 0 : index
    %c0_31 = arith.constant 0 : index
    %41 = vector.load %arg13[%c0_30, %c0_31] : memref<8x512xf32, #tpu.memory_space<vmem>>, vector<8x512xf32>
    tpu.vector_store %arg13[%c0_30, %c0_31], %32 {strides = array<i32>} : memref<8x512xf32, #tpu.memory_space<vmem>>, vector<8x512xf32>,
    return
  }
  func.func @transform_0(%arg0: i32) -> (i32, i32) {
    %c0_i32 = arith.constant 0 : i32
    %c0_i32_0 = arith.constant 0 : i32
    return %arg0, %c0_i32 : i32, i32
  }
  func.func @transform_1(%arg0: i32) -> (i32, i32) {
    %c0_i32 = arith.constant 0 : i32
    %c0_i32_0 = arith.constant 0 : i32
    %c0_i32_1 = arith.constant 0 : i32
    return %c0_i32, %c0_i32_0 : i32, i32
  }
  func.func @transform_2(%arg0: i32) -> (i32, i32) {
    %c0_i32 = arith.constant 0 : i32
    %c0_i32_0 = arith.constant 0 : i32
    %c0_i32_1 = arith.constant 0 : i32
    return %c0_i32, %c0_i32_0 : i32, i32
  }
  func.func @transform_3(%arg0: i32) -> (i32, i32) {
    %c0_i32 = arith.constant 0 : i32
    %c0_i32_0 = arith.constant 0 : i32
    %c0_i32_1 = arith.constant 0 : i32
    return %c0_i32, %c0_i32_0 : i32, i32
  }
  func.func @transform_4(%arg0: i32) -> (i32, i32) {
    %c0_i32 = arith.constant 0 : i32
    %c0_i32_0 = arith.constant 0 : i32
    %c0_i32_1 = arith.constant 0 : i32
    return %c0_i32, %c0_i32_0 : i32, i32
  }
  func.func @transform_5(%arg0: i32) -> (i32, i32) {
    %c0_i32 = arith.constant 0 : i32
    %c0_i32_0 = arith.constant 0 : i32
    %c0_i32_1 = arith.constant 0 : i32
    return %c0_i32, %c0_i32_0 : i32, i32
  }
  func.func @transform_6(%arg0: i32) -> (i32, i32) {
    %c0_i32 = arith.constant 0 : i32
    %c0_i32_0 = arith.constant 0 : i32
    %c0_i32_1 = arith.constant 0 : i32
    return %c0_i32, %c0_i32_0 : i32, i32
  }
  func.func @transform_7(%arg0: i32) -> (i32, i32) {
    %c0_i32 = arith.constant 0 : i32
    %c0_i32_0 = arith.constant 0 : i32
    %c0_i32_1 = arith.constant 0 : i32
    return %c0_i32, %c0_i32_0 : i32, i32
  }
  func.func @transform_8(%arg0: i32) -> (i32, i32) {
    %c0_i32 = arith.constant 0 : i32
    %c0_i32_0 = arith.constant 0 : i32
    %c0_i32_1 = arith.constant 0 : i32
    return %c0_i32, %c0_i32_0 : i32, i32
  }
  func.func @transform_9(%arg0: i32) -> (i32, i32) {
    %c0_i32 = arith.constant 0 : i32
    %c0_i32_0 = arith.constant 0 : i32
    return %arg0, %c0_i32 : i32, i32
  }
  func.func @transform_10(%arg0: i32) -> (i32, i32) {
    %c0_i32 = arith.constant 0 : i32
    %c0_i32_0 = arith.constant 0 : i32
    return %arg0, %c0_i32 : i32, i32
  }
  func.func @transform_11(%arg0: i32) -> (i32, i32) {
    %c0_i32 = arith.constant 0 : i32
    %c0_i32_0 = arith.constant 0 : i32
    return %arg0, %c0_i32 : i32, i32
  }
  func.func @transform_12(%arg0: i32) -> (i32, i32) {
    %c0_i32 = arith.constant 0 : i32
    %c0_i32_0 = arith.constant 0 : i32
    return %arg0, %c0_i32 : i32, i32
  }
}

</mosaic_0001>

<bundles_post_ra>
// kernel: encoder_forward.1
= control target key start
LH: loop header
LB: loop body
LE: loop exit
PB: predicated region body
PF: predicated region fallthrough
CT: control target
= control target key end

     0   :  { %s2497_s0 = inlined_call_operand.hbm [shape: f32[16,32], index: 0, kind: input, shape index: {}]   ;;  %s2498_s1 = inlined_call_operand.hbm [shape: bf16[32,32], index: 1, kind: input, shape index: {}]   ;;  %s2499_s2 = inlined_call_operand.hbm [shape: f32[1,32], index: 2, kind: input, shape index: {}]   ;;  %s2500_s3 = inlined_call_operand.hbm [shape: bf16[32,64], index: 3, kind: input, shape index: {}]   ;;  %s2501_s4 = inlined_call_operand.vmem [shape: f32[1,64], index: 4, kind: input, shape index: {}]   ;;  %s2502_s5 = inlined_call_operand.hbm [shape: bf16[64,64], index: 5, kind: input, shape index: {}]   ;;  %s2503_s6 = inlined_call_operand.vmem [shape: f32[1,64], index: 6, kind: input, shape index: {}]   ;;  %s2504_s7 = inlined_call_operand.hbm [shape: bf16[64,1024], index: 7, kind: input, shape index: {}]   ;;  %s2505_s8 = inlined_call_operand.hbm [shape: f32[1,1024], index: 8, kind: input, shape index: {}]   ;;  %s2506_s9 = inlined_call_operand.hbm [shape: f32[16,512], index: 9, kind: input, shape index: {}]   ;;  %s2507_s10 = inlined_call_operand.hbm [shape: f32[16,512], index: 10, kind: output, shape index: {0}]   ;;  %s2508_s11 = inlined_call_operand.hbm [shape: f32[16,512], index: 11, kind: output, shape index: {1}]   ;;  %s2509_s12 = inlined_call_operand.hbm [shape: f32[16,512], index: 12, kind: output, shape index: {2}]  }
   0x1   :  { %2514 = sst [smem:[#allocation29_spill]] %s2498_s1 }
   0x2   :  { %2515 = sst [smem:[#allocation30_spill]] %s2499_s2 }
   0x3   :  { %2516 = sst [smem:[#allocation31_spill]] %s2500_s3 }
   0x4   :  { %2517 = sst [smem:[#allocation32_spill]] %s2502_s5 }
   0x5   :  { %2518 = sst [smem:[#allocation33_spill]] %s2504_s7 }
   0x6   :  { %2519 = sst [smem:[#allocation34_spill]] %s2505_s8 }
   0x7   :  { %2520 = sst [smem:[#allocation35_spill]] %s2507_s10 }
   0x8   :  { %2521 = sst [smem:[#allocation36_spill]] %s2509_s12 }
   0x9   :  { %18 = vsyncpa [#allocation3], 0 }
   0xa   :  { %20 = vsyncpa [#allocation3 + $0x1], 0 }
   0xb   :  { %21 = vsyncpa [#allocation6], 0 }
   0xc   :  { %22 = vsyncpa [#allocation9], 0 }
   0xd   :  { %23 = vsyncpa [#allocation12], 0 }
   0xe   :  { %24 = vsyncpa [#allocation15], 0 }
   0xf   :  { %26 = vsyncpa [#allocation15 + $0x1], 0 }
  0x10   :  { %27 = vsyncpa [#allocation4], 0 }
  0x11   :  { %29 = vsyncpa [#allocation4 + $0x1], 0 }
  0x12   :  { %30 = vsyncpa [#allocation18], 0 }
  0x13   :  { %32 = vsyncpa [#allocation18 + $0x1], 0  ;;  %s2190_s21 = smov 0   ;;  %s2192_s22 = smov 0  }
  0x14   :  { %s2194_s23 = smov 0   ;;  %s2196_s24 = smov 0  }
  0x15 LB: > { %2522 = sst [smem:[#allocation27_spill]] %s2109_s23  ;;  %s2214_s28 = sadd.s32 4294967295, %s2113_s24   ;;  %s2113_s24 = sphi %s2196_s24, %s2545_s24   ;;  %s2109_s23 = sphi %s2194_s23, %s2542_s23   ;;  %s2105_s22 = sphi %s2192_s22, %s2544_s22   ;;  %s2101_s21 = sphi %s2190_s21, %s2543_s21  }
  0x16   : > { %s2523_s1 = sld [smem:[#allocation29_spill]]  ;;  %p1343_p0 = scmp.ge.s32.totalorder %s2113_s24, 1 }
  0x17   : > { %p59_p1 = scmp.eq.s32.totalorder %s2214_s28, 0  ;;  %p341_p2 = scmp.lt.s32.totalorder %s2113_s24, 3 }
  0x18   : > { %s2115_s30 = smov [#allocation5]   ;;  %s2525_s3 = sld [smem:[#allocation31_spill]] }
  0x19   : > { %p2219_p3 = pnand %p1343_p0, %p341_p2  ;;  %s354_s13 = sshll.u32 %s2115_s30, 4  ;;  %s355_s13 = int_to_ptr.vmem [resolvable:$true] %s354_s13 }
  0x1a   : > { %s2527_s7 = sld [smem:[#allocation33_spill]]  ;;  %s2116_s25 = smov [#allocation8]  }
  0x1b   : > { %p1628_p4 = pneg %p2219_p3  ;;  %s380_s26 = sshll.u32 %s2116_s25, 4  ;;  %s381_s26 = int_to_ptr.vmem [resolvable:$true] %s380_s26 }
  0x1c   : > { %s352_s27 = sshll.u32 %s2523_s1, 4  ;;  %s2117_s30 = smov 64   ;;  %s353_s27 = int_to_ptr.hbm [resolvable:$true] %s352_s27 }
  0x1d   : > { %p2231_p6 = pnand %p1628_p4, %p59_p1  ;;  %s2118_s1 = smov 4  }
  0x1e   : > { %s378_s16 = sshll.u32 %s2525_s3, 4  ;;  %s2119_s14 = smov [#allocation11]   ;;  %s379_s16 = int_to_ptr.hbm [resolvable:$true] %s378_s16 }
  0x1f   : > { %1631 = dma.hbm_to_vmem [thread:$0]  (!%p2231_p6), %s353_s27, 256, %s355_s13, [#allocation6], %s2117_s30, %s2117_s30, %s2118_s1  }
  0x20   : > { %s412_s20 = sshll.u32 %s2527_s7, 4  ;;  %s414_s15 = sshll.u32 %s2119_s14, 4  ;;  %s413_s20 = int_to_ptr.hbm [resolvable:$true] %s412_s20  ;;  %s415_s15 = int_to_ptr.vmem [resolvable:$true] %s414_s15 }
  0x21   : > { %1637 = dma.hbm_to_vmem [thread:$0]  (!%p2231_p6), %s379_s16, 256, %s381_s26, [#allocation9], %s2117_s30, %s2117_s30, %s2118_s1  }
  0x22   : > { %s2528_s2 = sld [smem:[#allocation30_spill]]  ;;  %s2120_s19 = smov 512  }
  0x23   : > { %s2121_s7 = smov 32   ;;  %s2122_s27 = smov [#allocation7]  }
  0x24   : > { %1643 = dma.hbm_to_vmem [thread:$0]  (!%p2231_p6), %s413_s20, 4096, %s415_s15, [#allocation12], %s2120_s19, %s2120_s19, %s2121_s7  }
  0x25   : > { %s369_s13 = sshll.u32 %s2122_s27, 4  ;;  %s2529_s5 = sld [smem:[#allocation32_spill]]  ;;  %s370_s13 = int_to_ptr.vmem [resolvable:$true] %s369_s13 }
  0x26   : > { %s2530_s8 = sld [smem:[#allocation34_spill]]  ;;  %s2123_s20 = smov [#allocation10]  }
  0x27   : > { %s397_s26 = sshll.u32 %s2123_s20, 4  ;;  %s2124_s12 = smov [#allocation13]   ;;  %s398_s26 = int_to_ptr.vmem [resolvable:$true] %s397_s26 }
  0x28   : > { %s367_s18 = sshll.u32 %s2528_s2, 4  ;;  %s429_s14 = sshll.u32 %s2124_s12, 4  ;;  %s368_s18 = int_to_ptr.hbm [resolvable:$true] %s367_s18  ;;  %s430_s14 = int_to_ptr.vmem [resolvable:$true] %s429_s14 }
  0x29   : > { %1634 = dma.hbm_to_vmem [thread:$0]  (!%p2231_p6), %s368_s18, 16, %s370_s13, [#allocation6]  }
  0x2a   : > { %s2512_s15 = sadd.s32 4294967294, %s2113_s24   ;;  %s2261_s18 = sadd.s32 1, %s2113_s24  }
  0x2b   : > { %s395_s16 = sshll.u32 %s2529_s5, 4  ;;  %s42_s19 = ssub.s32 %s2113_s24, %s2261_s18  ;;  %s396_s16 = int_to_ptr.hbm [resolvable:$true] %s395_s16 }
  0x2c   : > { %s427_s7 = sshll.u32 %s2530_s8, 4  ;;  %s45_s27 = sadd.s32 1, %s2109_s23  ;;  %s428_s7 = int_to_ptr.hbm [resolvable:$true] %s427_s7 }
  0x2d   : > { %1640 = dma.hbm_to_vmem [thread:$0]  (!%p2231_p6), %s396_s16, 512, %s398_s26, [#allocation9], %s2117_s30, %s2117_s30, %s2118_s1  }
  0x2e   : > { %1646 = dma.hbm_to_vmem [thread:$0]  (!%p2231_p6), %s428_s7, 128, %s430_s14, [#allocation12]  }
  0x2f   : > { %p43_p7 = scmp.eq.s32.totalorder %s42_s19, 0  ;;  %p52_p8 = scmp.ne.s32.totalorder %s2109_s23, %s2105_s22 }
  0x30   : > { %p53_p9 = scmp.eq.s32.totalorder %s2113_s24, 0  ;;  %p58_p10 = scmp.ne.s32.totalorder %s2105_s22, %s2101_s21 }
  0x31   : > { %s2272_s1 = scalar_select %p43_p7, %s2109_s23, %s45_s27  }
  0x32   : > { %p2274_p11 = por %p53_p9, %p52_p8  ;;  %p2280_p12 = por %p59_p1, %p58_p10 }
  0x33   : > { %2531 = sst [smem:[#allocation28_spill]] %s2272_s1  ;;  %p276_p13 = scmp.eq.s32.totalorder %s2214_s28, 1 }
  0x34   : > { %p282_p0 = scmp.eq.s32.totalorder %s2512_s15, 1  ;;  %p1670_p2 = scmp.lt.s32.totalorder %s2113_s24, 2 }
  0x35   : > { %s2289_s13 = sand.u32 1, %s2109_s23   ;;  %p2291_p4 = por %p276_p13, %p52_p8 }
  0x36   : > { %p2295_p6 = por %p282_p0, %p58_p10  ;;  %s1351_s3 = sshll.u32 %s2289_s13, 3 }
  0x37   : > { %s1352_s10 = sshll.u32 %s2113_s24, 3  ;;  %s444_s12 = scalar_lea.vmem [#allocation2], %s1351_s3 }
  0x38   : > { %s448_s26 = scalar_lea.hbm %s2497_s0, %s1352_s10  ;;  %s452_s14 = sshll.u32 %s444_s12, 4  ;;  %s453_s14 = int_to_ptr.vmem [resolvable:$true] %s452_s14 }
  0x39   : > { %s450_s19 = sshll.u32 %s448_s26, 4  ;;  %p2306_p7 = pnand %p1670_p2, %p2274_p11  ;;  %s451_s19 = int_to_ptr.hbm [resolvable:$true] %s450_s19 }
  0x3a   : > { %s1353_s15 = sshll.u32 %s2289_s13, 5  ;;  %s441_s2 = scalar_lea.sflag [#allocation3], %s2289_s13 }
  0x3b   : > { %s1911_s5 = sshra.s32 %s451_s19, 4  ;;  %p1915_p9 = pneg %p2306_p7  ;;  %s1912_s5 = int_to_ptr.hbm [resolvable:$true] %s1911_s5 }
  0x3c   : > { %s1913_s8 = scalar_lea.hbm %s1912_s5, 8  ;;  %s1918_s10 = scalar_lea.hbm %s2497_s0, 16 }
  0x3d   : > { %p1914_p8 = scmp.ne.s32.totalorder %s1912_s5, %s1913_s8  ;;  %p1919_p11 = scmp.lt.s32.totalorder %s1912_s5, %s2497_s0 }
  0x3e   : > { %p1920_p0 = scmp.lt.s32.totalorder %s1918_s10, %s1913_s8 }
  0x3f   : > { %p1916_p10 = pnand %p1915_p9, %p1914_p8 }
  0x40   : > { %p1921_p2 = por %p1920_p0, %p1919_p11 }
  0x41   : > { %p1917_p13 = pneg %p1916_p10 }
  0x43   : > { %p1922_p5 = pnand %p1921_p2, %p1917_p13 }
  0x45   : > { %1925 = shalt.err (!%p1922_p5)
}
  0x46   : > { %1650 = dma.hbm_to_vmem [thread:$0]  (!%p2306_p7), %s451_s19, 128, %s453_s14, %s441_s2  }
  0x47   : > { %s1550_s26 = sshll.u32 %s2113_s24, 5  ;;  %s463_s12 = scalar_lea.vmem [#allocation14], %s1353_s15 }
  0x48   : > { %s472_s1 = sshll.u32 %s463_s12, 4  ;;  %s468_s30 = scalar_lea.hbm %s2506_s9, %s1550_s26  ;;  %s473_s1 = int_to_ptr.vmem [resolvable:$true] %s472_s1 }
  0x49   : > { %s470_s7 = sshll.u32 %s468_s30, 4  ;;  %s460_s5 = scalar_lea.sflag [#allocation15], %s2289_s13  ;;  %s471_s7 = int_to_ptr.hbm [resolvable:$true] %s470_s7 }
  0x4a   : > { %s1941_s8 = sshra.s32 %s471_s7, 4  ;;  %s1948_s15 = scalar_lea.hbm %s2506_s9, 64  ;;  %s1942_s8 = int_to_ptr.hbm [resolvable:$true] %s1941_s8 }
  0x4b   : > { %s1943_s10 = scalar_lea.hbm %s1942_s8, 32  ;;  %p1949_p13 = scmp.lt.s32.totalorder %s1942_s8, %s2506_s9 }
  0x4c   : > { %p1944_p5 = scmp.ne.s32.totalorder %s1942_s8, %s1943_s10  ;;  %p1950_p11 = scmp.lt.s32.totalorder %s1948_s15, %s1943_s10 }
  0x4e   : > { %p1946_p8 = pnand %p1944_p5, %p1915_p9  ;;  %p1951_p0 = por %p1950_p11, %p1949_p13 }
  0x50   : > { %p1947_p10 = pneg %p1946_p8 }
  0x52   : > { %p1952_p2 = pnand %p1951_p0, %p1947_p10 }
  0x54   : > { %1955 = shalt.err (!%p1952_p2)
}
  0x55   : > { %1653 = dma.hbm_to_vmem [thread:$0]  (!%p2306_p7), %s471_s7, 512, %s473_s1, %s460_s5  }
  0x56   : > { %481 = sbr.rel (%p2219_p3) target bundleno = 689 (0x2b1), region = 60  ;;  %s2344_s23 = sand.u32 (!%p2219_p3), 1, %s2105_s22  }
  0x57   : > { %s1357_s13 = sshll.u32 (!%p2219_p3), %s2344_s23, 3  ;;  %s484_s26 = scalar_lea.sflag (!%p2219_p3), [#allocation3], %s2344_s23 }
  0x58   : > { %s487_s12 = scalar_lea.vmem (!%p2219_p3), [#allocation2], %s1357_s13 }
  0x5b   : > { %2072 = dma.done.wait (%p2280_p12), %s484_s26, 128  }
  0x5c   : > { %2074 = vsyncadd (%p2280_p12), %s484_s26, 4294967168 }
  0x5d   : > { %2076 = dma.done.wait (%p59_p1), [#allocation6], 272  }
  0x5e   : > { %2078 = vsyncadd (%p59_p1), [#allocation6], 4294967024 }
  0x5f   : > { %2080 = dma.done.wait (%p59_p1), [#allocation9], 768  }
  0x60   : > { %2082 = vsyncadd (%p59_p1), [#allocation9], 4294966528 }
  0x61   : > { %2084 = dma.done.wait (%p59_p1), [#allocation12], 4224  }
  0x62   : > { %2086 = vsyncadd (%p59_p1), [#allocation12], 4294963072  ;;  %s2365_s29 = sshll.u32 %s2344_s23, 5  ;;  %s524_s1 = scalar_lea.sflag [#allocation15], %s2344_s23 }
  0x63   : > { %s2369_s27 = scalar_lea.vmem [#allocation14], %s2365_s29 }
  0x64   : > { %2088 = dma.done.wait (%p2280_p12), %s524_s1, 512  }
  0x65   : > { %2090 = vsyncadd (%p2280_p12), %s524_s1, 4294966784  ;;  %v1552_v0 = vld [vmem:[#allocation5 + $0x8] sm:$0xff]  ;;  %v1551_v1 = vld [vmem:[#allocation5] sm:$0xff]  ;;  %vm607_vm0 = vcmask 261120   ;;  %vm700_vm1 = vcmask 523264   ;;  %s2395_s5 = sshll.u32 %s2214_s28, 5 }
  0x66   : > { %617 = vmatpush.bf16.msra.mxu0 %v1552_v0  ;;  %v585_v2 = vld [vmem:[%s487_s12] sm:$0xff]  ;;  %v1555_v15 = vld [vmem:[#allocation10] sm:$0xff]  ;;  %v1509_v25 = vld [vmem:[#allocation11 + $0xc8] sm:$0xf]  ;;  %s1109_s2 = scalar_lea.hbm %s2508_s11, %s2395_s5  ;;  %s576_s14 = scalar_lea.vmem [#allocation17], %s2365_s29 }
  0x67   : > { %v586_v3 = vpack.c.bf16 %v585_v2, %v585_v2  ;;  %v1554_v4 = vld [vmem:[#allocation8 + $0x8] sm:$0xff]  ;;  %v1553_v5 = vld [vmem:[#allocation8] sm:$0xff]  ;;  %v1720_v8 = vld [vmem:[#allocation7] ss:$0 sm:$0xff]  ;;  %s1077_s15 = sand.u32 1, %s2214_s28   ;;  %s1111_s19 = sshll.u32 %s576_s14, 4  ;;  %s1112_s19 = int_to_ptr.vmem [resolvable:$true] %s1111_s19 }
  0x68   : > { %655 = vmatpush.bf16.msra.mxu1 %v1554_v4  ;;  %v1558_v6 = vld [vmem:[#allocation10 + $0x18] sm:$0xff]  ;;  %v1557_v7 = vld [vmem:[#allocation10 + $0x10] sm:$0xff]  ;;  %v1556_v14 = vld [vmem:[#allocation10 + $0x8] sm:$0xff]  ;;  %s1113_s20 = sshll.u32 %s1109_s2, 4  ;;  %s2417_s13 = scalar_lea.sflag [#allocation18], %s1077_s15  ;;  %s1114_s20 = int_to_ptr.hbm [resolvable:$true] %s1113_s20 }
  0x69   : > { %708 = vmatpush.bf16.msra.mxu2 %v1558_v6  ;;  %v1584_v16 = vld [vmem:[#allocation11 + $0xcc] sm:$0xf]  ;;  %v1501_v18 = vld [vmem:[#allocation11 + $0xc0] sm:$0xf]  ;;  %v1583_v21 = vld [vmem:[#allocation11 + $0xc4] sm:$0xf] }
  0x6a   : > { %618 = vmatpush.bf16.msra.mxu0 %v1551_v1  ;;  %v1511_v17 = vld [vmem:[#allocation11 + $0xe8] sm:$0xf0]  ;;  %v1587_v20 = vld [vmem:[#allocation11 + $0xdc] sm:$0xf0]  ;;  %v1503_v22 = vld [vmem:[#allocation11 + $0xe0] sm:$0xf0] }
  0x6b   : > { %v1514_v19 = vor.u32 %v1584_v16, %v1511_v17  ;;  %v1502_v23 = vor.u32 %v1587_v20, %v1501_v18  ;;  %v1506_v24 = vor.u32 %v1583_v21, %v1503_v22  ;;  %v1588_v26 = vld [vmem:[#allocation11 + $0xe4] sm:$0xf0]  ;;  %v1576_v27 = vld [vmem:[#allocation11 + $0x8c] sm:$0xf]  ;;  %v1469_v30 = vld [vmem:[#allocation11 + $0x80] sm:$0xf] }
  0x6c   : > { %656 = vmatpush.bf16.msra.mxu1 %v1553_v5  ;;  %v1510_v28 = vor.u32 %v1588_v26, %v1509_v25  ;;  %v1479_v29 = vld [vmem:[#allocation11 + $0xa8] sm:$0xf0]  ;;  %v1579_v31 = vld [vmem:[#allocation11 + $0x9c] sm:$0xf0]  ;;  %v1575_v34 = vld [vmem:[#allocation11 + $0x84] sm:$0xf] }
  0x6d   : > { %1376 = vmatmul.msk.bf16.vlgmr.msra.gmra.mxu0 %vm607_vm0, %v586_v3  ;;  %709 = vmatpush.bf16.msra.mxu2 %v1557_v7  ;;  %v1482_v32 = vor.u32 %v1576_v27, %v1479_v29  ;;  %v1470_v33 = vor.u32 %v1579_v31, %v1469_v30  ;;  %v1471_v35 = vld [vmem:[#allocation11 + $0xa0] sm:$0xf0]  ;;  %v1477_v36 = vld [vmem:[#allocation11 + $0x88] sm:$0xf]  ;;  %v1568_v39 = vld [vmem:[#allocation11 + $0x4c] sm:$0xf] }
  0x6e   : > { %936 = vmatpush.bf16.msra.mxu3 %v1502_v23  ;;  %949 = vmatpush.bf16.msrb.mxu0 %v1506_v24  ;;  %v1474_v37 = vor.u32 %v1575_v34, %v1471_v35  ;;  %v1580_v38 = vld [vmem:[#allocation11 + $0xa4] sm:$0xf0]  ;;  %v1447_v40 = vld [vmem:[#allocation11 + $0x68] sm:$0xf0]  ;;  %v1437_v49 = vld [vmem:[#allocation11 + $0x40] sm:$0xf] }
  0x6f   : > { %v1478_v41 = vor.u32 %v1580_v38, %v1477_v36  ;;  %v1450_v42 = vor.u32 %v1568_v39, %v1447_v40  ;;  %v1721_v43 = vld [vmem:[%s2501_s4] ss:$0 sm:$0xff]  ;;  %v1571_v50 = vld [vmem:[#allocation11 + $0x5c] sm:$0xf0]  ;;  %v1567_v51 = vld [vmem:[#allocation11 + $0x44] sm:$0xf] }
  0x70   : > { %962 = vmatpush.bf16.msrb.mxu1 %v1510_v28  ;;  %v1438_v52 = vor.u32 %v1571_v50, %v1437_v49  ;;  %v1439_v53 = vld [vmem:[#allocation11 + $0x60] sm:$0xf0]  ;;  %v1445_v54 = vld [vmem:[#allocation11 + $0x48] sm:$0xf]  ;;  %v1560_v58 = vld [vmem:[#allocation11 + $0xc] sm:$0xf] }
  0x71   : > { %710 = vmatpush.bf16.msra.mxu2 %v1556_v14  ;;  %v1572_v55 = vld [vmem:[#allocation11 + $0x64] sm:$0xf0]  ;;  %v1442_v56 = vor.u32 %v1567_v51, %v1439_v53  ;;  %v1415_v59 = vld [vmem:[#allocation11 + $0x28] sm:$0xf0]  ;;  %v1405_v60 = vld [vmem:[#allocation11] sm:$0xf] }
  0x72   : > { %937 = vmatpush.bf16.msra.mxu3 %v1470_v33  ;;  %950 = vmatpush.bf16.msrb.mxu0 %v1474_v37  ;;  %v1446_v57 = vor.u32 %v1572_v55, %v1445_v54  ;;  %v1418_v61 = vor.u32 %v1560_v58, %v1415_v59  ;;  %v1563_v62 = vld [vmem:[#allocation11 + $0x1c] sm:$0xf0]  ;;  %v1559_v63 = vld [vmem:[#allocation11 + $0x4] sm:$0xf]  ;;  %v1413_v3 = vld [vmem:[#allocation11 + $0x8] sm:$0xf] }
  0x73   : > { %v1407_v0 = vld [vmem:[#allocation11 + $0x20] sm:$0xf0]  ;;  %v1406_v1 = vor.u32 %v1563_v62, %v1405_v60  ;;  %v1564_v4 = vld [vmem:[#allocation11 + $0x24] sm:$0xf0]  ;;  %v1517_v6 = vld [vmem:[#allocation11 + $0xd0] sm:$0xf] }
  0x74   : > { %963 = vmatpush.bf16.msrb.mxu1 %v1478_v41  ;;  %v1410_v2 = vor.u32 %v1559_v63, %v1407_v0  ;;  %v1414_v5 = vor.u32 %v1564_v4, %v1413_v3  ;;  %v1589_v7 = vld [vmem:[#allocation11 + $0xec] sm:$0xf0]  ;;  %v1590_v16 = vld [vmem:[#allocation11 + $0xf4] sm:$0xf0]  ;;  %v1578_v20 = vld [vmem:[#allocation11 + $0x9c] sm:$0xf] }
  0x75   : > { %711 = vmatpush.bf16.msra.mxu2 %v1555_v15  ;;  %v1525_v15 = vld [vmem:[#allocation11 + $0xd8] sm:$0xf]  ;;  %v1485_v17 = vld [vmem:[#allocation11 + $0x90] sm:$0xf]  ;;  %v1495_v21 = vld [vmem:[#allocation11 + $0xb8] sm:$0xf0] }
  0x76   : > { %938 = vmatpush.bf16.msra.mxu3 %v1438_v52  ;;  %951 = vmatpush.bf16.msrb.mxu0 %v1442_v56  ;;  %v1526_v18 = vor.u32 %v1590_v16, %v1525_v15  ;;  %v1498_v23 = vor.u32 %v1578_v20, %v1495_v21  ;;  %v1577_v24 = vld [vmem:[#allocation11 + $0x94] sm:$0xf]  ;;  %v1493_v26 = vld [vmem:[#allocation11 + $0x98] sm:$0xf]  ;;  %v1453_v29 = vld [vmem:[#allocation11 + $0x50] sm:$0xf] }
  0x77   : > { %v1487_v25 = vld [vmem:[#allocation11 + $0xb0] sm:$0xf0]  ;;  %v1582_v28 = vld [vmem:[#allocation11 + $0xb4] sm:$0xf0]  ;;  %v1573_v30 = vld [vmem:[#allocation11 + $0x6c] sm:$0xf0] }
  0x78   : > { %964 = vmatpush.bf16.msrb.mxu1 %v1446_v57  ;;  %v1490_v27 = vor.u32 %v1577_v24, %v1487_v25  ;;  %v1494_v31 = vor.u32 %v1582_v28, %v1493_v26  ;;  %v1463_v33 = vld [vmem:[#allocation11 + $0x78] sm:$0xf0]  ;;  %v1569_v34 = vld [vmem:[#allocation11 + $0x54] sm:$0xf]  ;;  %v1454_v35 = vor.u32 %v1573_v30, %v1453_v29  ;;  %v1461_v37 = vld [vmem:[#allocation11 + $0x58] sm:$0xf] }
  0x79   : > { %975 = vmatpush.bf16.msrb.mxu2 %v1514_v19  ;;  %v1581_v19 = vld [vmem:[#allocation11 + $0xac] sm:$0xf0]  ;;  %v1455_v36 = vld [vmem:[#allocation11 + $0x70] sm:$0xf0]  ;;  %v1574_v38 = vld [vmem:[#allocation11 + $0x74] sm:$0xf0] }
  0x7a   : > { %939 = vmatpush.bf16.msra.mxu3 %v1406_v1  ;;  %952 = vmatpush.bf16.msrb.mxu0 %v1410_v2  ;;  %v1486_v22 = vor.u32 %v1581_v19, %v1485_v17  ;;  %v1458_v40 = vor.u32 %v1569_v34, %v1455_v36  ;;  %v1421_v41 = vld [vmem:[#allocation11 + $0x10] sm:$0xf]  ;;  %v1566_v49 = vld [vmem:[#allocation11 + $0x34] sm:$0xf0]  ;;  %v1722_v54 = vld [vmem:[%s2503_s6] ss:$0 sm:$0xff] }
  0x7b   : > { %v2390_v60 = vld [vmem:[#allocation13] sm:$0xff]  ;;  %s1985_s28 = sshra.s32 %s1114_s20, 4  ;;  %s1991_s17 = scalar_lea.hbm %s2508_s11, 64  ;;  %s1986_s28 = int_to_ptr.hbm [resolvable:$true] %s1985_s28 }
  0x7c   : > { %965 = vmatpush.bf16.msrb.mxu1 %v1414_v5  ;;  %v755_v62 = vperm.slane %v2390_v60, 2  ;;  %v753_v3 = vperm.slane %v2390_v60, 0  ;;  %v756_v4 = vperm.slane %v2390_v60, 3  ;;  %s1987_s26 = scalar_lea.hbm %s1986_s28, 32  ;;  %p1992_p7 = scmp.lt.s32.totalorder %s1986_s28, %s2508_s11 }
  0x7d   : > { %976 = vmatpush.bf16.msrb.mxu2 %v1482_v32  ;;  %v1570_v32 = vld [vmem:[#allocation11 + $0x5c] sm:$0xf]  ;;  %p1988_p1 = scmp.ne.s32.totalorder %s1986_s28, %s1987_s26  ;;  %p1993_p9 = scmp.lt.s32.totalorder %s1991_s17, %s1987_s26 }
  0x7e   : > { %v1466_v39 = vor.u32 %v1570_v32, %v1463_v33 }
  0x7f   : > { %p1989_p3 = pnand %p1988_p1, %p2291_p4  ;;  %p1994_p5 = por %p1993_p9, %p1992_p7 }
  0x81   : > { %977 = vmatpush.bf16.msrb.mxu2 %v1450_v42  ;;  %v1565_v42 = vld [vmem:[#allocation11 + $0x2c] sm:$0xf0]  ;;  %p1990_p12 = pneg %p1989_p3 }
  0x82   : > { %v1422_v50 = vor.u32 %v1565_v42, %v1421_v41 }
  0x83   : > { %p1995_p8 = pnand %p1994_p5, %p1990_p12 }
  0x85   : > { %978 = vmatpush.bf16.msrb.mxu2 %v1418_v61  ;;  %v754_v61 = vperm.slane %v2390_v60, 1 }
  0xea   : > { %v620_v9 = vpop.f32.mrf.mxu0 }
  0xeb   : > { %v621_v10 = vadd.f32 %v1720_v8, %v620_v9  ;;  %v1586_v8 = vld [vmem:[#allocation11 + $0xdc] sm:$0xf]  ;;  %v1518_v9 = vor.u32 %v1589_v7, %v1517_v6 }
  0xed   : > { %v624_v11 = vmax.f32 %v621_v10, 0.0  ;;  %v1527_v10 = vld [vmem:[#allocation11 + $0xf8] sm:$0xf0]  ;;  %988 = vmatpush.bf16.msrb.mxu3 %v1518_v9 }
  0xef   : > { %v625_v12 = vpack.c.bf16 %v624_v11, %v624_v11  ;;  %v1585_v11 = vld [vmem:[#allocation11 + $0xd4] sm:$0xf] }
  0xf1   : > { %1385 = vmatmul.msk.bf16.vlgmr.msra.gmra.mxu1 %vm607_vm0, %v625_v12  ;;  %v1519_v12 = vld [vmem:[#allocation11 + $0xf0] sm:$0xf0]  ;;  %989 = vmatpush.bf16.msrb.mxu3 %v1486_v22 }
  0xf2   : > { %v622_v13 = vpop.f32.mrf.mxu0  ;;  %v1522_v14 = vor.u32 %v1585_v11, %v1519_v12  ;;  %1014 = vmatpush.bf16.msra.mxu1 %v1526_v18 }
  0xf3   : > { %v1530_v13 = vor.u32 %v1586_v8, %v1527_v10 }
  0xf4   : > { %1001 = vmatpush.bf16.msra.mxu0 %v1522_v14 }
  0xf5   : > { %990 = vmatpush.bf16.msrb.mxu3 %v1454_v35 }
  0xf6   : > { %1015 = vmatpush.bf16.msra.mxu1 %v1494_v31 }
  0xf8   : > { %1002 = vmatpush.bf16.msra.mxu0 %v1490_v27 }
  0xf9   : > { %991 = vmatpush.bf16.msrb.mxu3 %v1422_v50 }
  0xfc   : > { %1003 = vmatpush.bf16.msra.mxu0 %v1458_v40 }
 0x16e   : > { %v658_v44 = vpop.f32.mrf.mxu1 }
 0x16f   : > { %v659_v45 = vadd.f32 %v1721_v43, %v658_v44  ;;  %v1562_v43 = vld [vmem:[#allocation11 + $0x1c] sm:$0xf]  ;;  %v1462_v44 = vor.u32 %v1574_v38, %v1461_v37 }
 0x171   : > { %v662_v46 = vmax.f32 %v659_v45, 0.0  ;;  %v1431_v45 = vld [vmem:[#allocation11 + $0x38] sm:$0xf0]  ;;  %1016 = vmatpush.bf16.msra.mxu1 %v1462_v44 }
 0x172   : > { %v1434_v51 = vor.u32 %v1562_v43, %v1431_v45 }
 0x173   : > { %v663_v47 = vpack.c.bf16 %v662_v46, %v662_v46  ;;  %v1561_v46 = vld [vmem:[#allocation11 + $0x14] sm:$0xf] }
 0x175   : > { %1402 = vmatmul.msk.bf16.vlgmr.msra.gmra.mxu2 %vm700_vm1, %v663_v47  ;;  %v1423_v47 = vld [vmem:[#allocation11 + $0x30] sm:$0xf0] }
 0x176   : > { %v660_v48 = vpop.f32.mrf.mxu1  ;;  %1027 = vmatpush.bf16.msra.mxu2 %v1530_v13  ;;  %v1426_v52 = vor.u32 %v1561_v46, %v1423_v47 }
 0x177   : > { %v1429_v48 = vld [vmem:[#allocation11 + $0x18] sm:$0xf] }
 0x178   : > { %v1430_v53 = vor.u32 %v1566_v49, %v1429_v48  ;;  %1004 = vmatpush.bf16.msra.mxu0 %v1426_v52 }
 0x17a   : > { %1028 = vmatpush.bf16.msra.mxu2 %v1498_v23  ;;  %1017 = vmatpush.bf16.msra.mxu1 %v1430_v53 }
 0x17e   : > { %1029 = vmatpush.bf16.msra.mxu2 %v1466_v39 }
 0x182   : > { %1030 = vmatpush.bf16.msra.mxu2 %v1434_v51 }
 0x1f8   : > { %v713_v55 = vpop.f32.mrf.mxu2 }
 0x1f9   : > { %v714_v56 = vadd.f32 %v1722_v54, %v713_v55 }
 0x1fb   : > { %v717_v57 = vmax.f32 %v714_v56, 0.0 }
 0x1fd   : > { %v718_v58 = vpack.c.bf16 %v717_v57, %v717_v57 }
 0x1ff   : > { %1531 = vmatmul.msk.bf16.vlgmr.msra.gmra.mxu3 %vm700_vm1, %v718_v58  ;;  %1532 = vmatmul.msk.bf16.vlgmr.msrb.gmra.mxu0 %vm700_vm1, %v718_v58 }
 0x200   : > { %1533 = vmatmul.msk.bf16.vlgmr.msrb.gmra.mxu1 %vm700_vm1, %v718_v58  ;;  %1534 = vmatmul.msk.bf16.vlgmr.msrb.gmra.mxu2 %vm700_vm1, %v718_v58  ;;  %v715_v59 = vpop.f32.mrf.mxu2 }
 0x20f   : > { %1535 = vmatmul.msk.bf16.vlgmr.msrb.gmra.mxu3 %vm700_vm1, %v718_v58  ;;  %1536 = vmatmul.msk.bf16.vlgmr.msra.gmra.mxu0 %vm700_vm1, %v718_v58 }
 0x210   : > { %1537 = vmatmul.msk.bf16.vlgmr.msra.gmra.mxu1 %vm700_vm1, %v718_v58  ;;  %1538 = vmatmul.msk.bf16.vlgmr.msra.gmra.mxu2 %vm700_vm1, %v718_v58 }
 0x27c   : > { %v954_v63 = vpop.f32.mrf.mxu0 }
 0x27d   : > { %v2397_v0 = vadd.f32 %v954_v63, %v754_v61  ;;  %v967_v1 = vpop.f32.mrf.mxu1 }
 0x27e   : > { %v2399_v2 = vadd.f32 %v967_v1, %v755_v62 }
 0x27f   : > { %1065 = vst [vmem:[%s576_s14 + $0x8] sm:$0xff] %v2397_v0 }
 0x280   : > { %1066 = vst [vmem:[%s576_s14 + $0x10] sm:$0xff] %v2399_v2 }
 0x282   : > { %v941_v5 = vpop.f32.mrf.mxu3 }
 0x283   : > { %v2411_v6 = vadd.f32 %v941_v5, %v753_v3  ;;  %v980_v7 = vpop.f32.mrf.mxu2 }
 0x284   : > { %v2413_v8 = vadd.f32 %v980_v7, %v756_v4  ;;  %v956_v9 = vpop.f32.mrf.mxu0 }
 0x285   : > { %1064 = vst [vmem:[%s576_s14] sm:$0xff] %v2411_v6  ;;  %v969_v10 = vpop.f32.mrf.mxu1 }
 0x286   : > { %1067 = vst [vmem:[%s576_s14 + $0x18] sm:$0xff] %v2413_v8 }
 0x287   : > { %1998 = shalt.err (!%p1995_p8)
}
 0x288   : > { %1623 = dma.vmem_to_hbm [thread:$0]  (%p2291_p4), %s1112_s19, 512, %s1114_s20, %s2417_s13   ;;  %v758_v11 = vperm.slane %v2390_v60, 5  ;;  %v759_v13 = vperm.slane %v2390_v60, 6  ;;  %v757_v20 = vperm.slane %v2390_v60, 4  ;;  %v760_v22 = vperm.slane %v2390_v60, 7  ;;  %v1049_v33 = vld [vmem:[%s2369_s27 + $0x8] sm:$0xff] }
 0x289   : > { %s2537_s10 = sld [smem:[#allocation36_spill]]  ;;  %s583_s14 = scalar_lea.vmem [#allocation19], %s2365_s29 }
 0x28a   : > { %v943_v12 = vpop.f32.mrf.mxu3  ;;  %s1126_s15 = sshll.u32 %s583_s14, 4  ;;  %s1127_s15 = int_to_ptr.vmem [resolvable:$true] %s1126_s15 }
 0x28b   : > { %v982_v14 = vpop.f32.mrf.mxu2 }
 0x28c   : > { %v1006_v15 = vpop.f32.mrf.mxu0 }
 0x28d   : > { %v1007_v16 = vadd.f32 %v1006_v15, %v758_v11  ;;  %v1019_v17 = vpop.f32.mrf.mxu1 }
 0x28e   : > { %v1020_v18 = vadd.f32 %v1019_v17, %v759_v13 }
 0x28f   : > { %s1124_s2 = scalar_lea.hbm %s2537_s10, %s2395_s5  ;;  %v1037_v19 = vmul.f32 0.5, %v1007_v16  ;;  %1069 = vst [vmem:[%s583_s14 + $0x8] sm:$0xff] %v1007_v16  ;;  %s2019_s1 = scalar_lea.hbm %s2537_s10, 64 }
 0x290   : > { %v1038_v21 = vmul.f32 0.5, %v1020_v18  ;;  %1070 = vst [vmem:[%s583_s14 + $0x10] sm:$0xff] %v1020_v18  ;;  %s2439_s19 = sshll.u32 %s1124_s2, 4  ;;  %s1129_s19 = int_to_ptr.hbm [resolvable:$true] %s2439_s19 }
 0x291   : > { %v1042_v23 = vmul.f32 1.442695, %v1037_v19  ;;  %s2013_s20 = sshra.s32 %s1129_s19, 4  ;;  %s2014_s20 = int_to_ptr.hbm [resolvable:$true] %s2013_s20 }
 0x292   : > { %v1044_v24 = vmul.f32 1.442695, %v1038_v21  ;;  %v993_v25 = vpop.f32.mrf.mxu3  ;;  %s2015_s28 = scalar_lea.hbm %s2014_s20, 32  ;;  %p2020_p0 = scmp.lt.s32.totalorder %s2014_s20, %s2537_s10 }
 0x293   : > { %1723 = vpow2.f32 %v1042_v23  ;;  %v994_v26 = vadd.f32 %v993_v25, %v757_v20  ;;  %v1032_v27 = vpop.f32.mrf.mxu2  ;;  %p2016_p10 = scmp.ne.s32.totalorder %s2014_s20, %s2015_s28  ;;  %p2021_p2 = scmp.lt.s32.totalorder %s2019_s1, %s2015_s28 }
 0x294   : > { %1725 = vpow2.f32 %v1044_v24  ;;  %v1033_v28 = vadd.f32 %v1032_v27, %v760_v22  ;;  %v1008_v29 = vpop.f32.mrf.mxu0 }
 0x295   : > { %v1036_v30 = vmul.f32 0.5, %v994_v26  ;;  %1068 = vst [vmem:[%s583_s14] sm:$0xff] %v994_v26  ;;  %v1021_v31 = vpop.f32.mrf.mxu1  ;;  %p2017_p13 = pnand %p2016_p10, %p2291_p4  ;;  %p2022_p1 = por %p2021_p2, %p2020_p0 }
 0x296   : > { %v1039_v32 = vmul.f32 0.5, %v1033_v28  ;;  %1071 = vst [vmem:[%s583_s14 + $0x18] sm:$0xff] %v1033_v28 }
 0x297   : > { %v1040_v34 = vmul.f32 1.442695, %v1036_v30  ;;  %p2018_p11 = pneg %p2017_p13 }
 0x299   : > { %p2023_p3 = pnand %p2022_p1, %p2018_p11 }
 0x29b   : > { %2026 = shalt.err (!%p2023_p3)
}
 0x29c   : > { %1624 = dma.vmem_to_hbm [thread:$0]  (%p2291_p4), %s1127_s15, 512, %s1129_s19, %s2417_s13   ;;  %v1050_v35 = vld [vmem:[%s2369_s27 + $0x10] sm:$0xff]  ;;  %v1046_v36 = vmul.f32 1.442695, %v1039_v32  ;;  %v1724_v37 = vpop.eup %1723  ;;  %1727 = vpow2.f32 %v1040_v34  ;;  %v995_v40 = vpop.f32.mrf.mxu3  ;;  %v1048_v45 = vld [vmem:[%s2369_s27] sm:$0xff]  ;;  %v1051_v46 = vld [vmem:[%s2369_s27 + $0x18] sm:$0xff] }
 0x29d   : > { %v1726_v38 = vpop.eup %1725  ;;  %v1053_v39 = vmul.f32 %v1724_v37, %v1049_v33  ;;  %v1034_v42 = vpop.f32.mrf.mxu2  ;;  %s2538_s8 = sld [smem:[#allocation35_spill]]  ;;  %s569_s2 = scalar_lea.vmem [#allocation16], %s2365_s29 }
 0x29e   : > { %1729 = vpow2.f32 %v1046_v36  ;;  %v1054_v41 = vmul.f32 %v1726_v38, %v1050_v35  ;;  %s1096_s14 = sshll.u32 %s569_s2, 4  ;;  %s1073_s27 = scalar_lea.sflag [#allocation4], %s2344_s23  ;;  %s1097_s14 = int_to_ptr.vmem [resolvable:$true] %s1096_s14 }
 0x29f   : > { %v1057_v43 = vadd.f32 %v1053_v39, %v2397_v0 }
 0x2a0   : > { %v1058_v44 = vadd.f32 %v1054_v41, %v2399_v2 }
 0x2a1   : > { %1061 = vst [vmem:[%s569_s2 + $0x8] sm:$0xff] %v1057_v43 }
 0x2a2   : > { %v1728_v47 = vpop.eup %1727  ;;  %1062 = vst [vmem:[%s569_s2 + $0x10] sm:$0xff] %v1058_v44 }
 0x2a3   : > { %s1094_s13 = scalar_lea.hbm %s2538_s8, %s2395_s5  ;;  %v1052_v49 = vmul.f32 %v1728_v47, %v1048_v45  ;;  %s2047_s28 = scalar_lea.hbm %s2538_s8, 64 }
 0x2a4   : > { %v1730_v48 = vpop.eup %1729  ;;  %s1098_s15 = sshll.u32 %s1094_s13, 4  ;;  %s1099_s15 = int_to_ptr.hbm [resolvable:$true] %s1098_s15 }
 0x2a5   : > { %v1055_v50 = vmul.f32 %v1730_v48, %v1051_v46  ;;  %v1056_v51 = vadd.f32 %v1052_v49, %v2411_v6  ;;  %s2041_s5 = sshra.s32 %s1099_s15, 4  ;;  %s2042_s5 = int_to_ptr.hbm [resolvable:$true] %s2041_s5 }
 0x2a6   : > { %s2043_s29 = scalar_lea.hbm %s2042_s5, 32  ;;  %p2048_p5 = scmp.lt.s32.totalorder %s2042_s5, %s2538_s8 }
 0x2a7   : > { %v1059_v52 = vadd.f32 %v1055_v50, %v2413_v8  ;;  %1060 = vst [vmem:[%s569_s2] sm:$0xff] %v1056_v51  ;;  %p2044_p12 = scmp.ne.s32.totalorder %s2042_s5, %s2043_s29  ;;  %p2049_p8 = scmp.lt.s32.totalorder %s2047_s28, %s2043_s29 }
 0x2a9   : > { %1063 = vst [vmem:[%s569_s2 + $0x18] sm:$0xff] %v1059_v52  ;;  %p2045_p7 = pnand %p2044_p12, %p2291_p4  ;;  %p2050_p10 = por %p2049_p8, %p2048_p5 }
 0x2ab   : > { %p2046_p9 = pneg %p2045_p7 }
 0x2ad   : > { %p2051_p13 = pnand %p2050_p10, %p2046_p9 }
 0x2af   : > { %2054 = shalt.err (!%p2051_p13)
}
 0x2b0   : > { %1622 = dma.vmem_to_hbm [thread:$0]  (%p2291_p4), %s1097_s14, 512, %s1099_s15, %s1073_s27  }
 0x2b1 PF: > { %s1140_s23 = sand.u32 1, %s2101_s21   ;;  %p2539_p11 = scmp.ge.s32.totalorder %s2113_s24, 2 }
 0x2b2   : > { %s1141_s1 = scalar_lea.sflag [#allocation4], %s1140_s23 }
 0x2b3   : > { %p1655_p0 = pnand %p2539_p11, %p2295_p6 }
 0x2b5   : > { %p1656_p2 = pneg %p1655_p0 }
 0x2b7   : > { %2092 = dma.done.wait (%p1656_p2), %s1141_s1, 512  }
 0x2b8   : > { %2094 = vsyncadd (%p1656_p2), %s1141_s1, 4294966784  ;;  %s2540_s17 = sadd.s32 4294967294, %s2113_s24  }
 0x2b9   : > { %s1150_s3 = sand.u32 1, %s2540_s17  }
 0x2ba   : > { %s1151_s30 = scalar_lea.sflag [#allocation18], %s1150_s3 }
 0x2bb   : > { %2096 = dma.done.wait (%p1656_p2), %s1151_s30, 1024  }
 0x2bc   : > { %2098 = vsyncadd (%p1656_p2), %s1151_s30, 4294966272  ;;  %s2541_s25 = sld [smem:[#allocation27_spill]]  ;;  %p35_p4 = scmp.ge.s32.totalorder %s2261_s18, 4  }
 0x2bd   : > { %s2542_s23 = sld [smem:[#allocation28_spill]]  ;;  %s2543_s21 = smov %s2105_s22 }
 0x2be   : > { %s2545_s24 = smov %s2261_s18  ;;  %37 = sbr.rel (!%p35_p4) target bundleno = 21 (0x15), region = 174 }
 0x2c2   : > { %s2544_s22 = smov %s2541_s25 }
 0x2c3   :  { %1167 = vsyncpa [#allocation3], 1 }
 0x2c4   :  { %1169 = vsyncpa [#allocation3 + $0x1], 1 }
 0x2c5   :  { %1170 = vsyncpa [#allocation6], 1 }
 0x2c6   :  { %1171 = vsyncpa [#allocation9], 1 }
 0x2c7   :  { %1172 = vsyncpa [#allocation12], 1 }
 0x2c8   :  { %1173 = vsyncpa [#allocation15], 1 }
 0x2c9   :  { %1175 = vsyncpa [#allocation15 + $0x1], 1 }
 0x2ca   :  { %1176 = vsyncpa [#allocation4], 1 }
 0x2cb   :  { %1178 = vsyncpa [#allocation4 + $0x1], 1 }
 0x2cc   :  { %1179 = vsyncpa [#allocation18], 1 }
 0x2cd   :  { %1181 = vsyncpa [#allocation18 + $0x1], 1 }

</bundles_post_ra>
